<compile_context>
chip_gen: v7x
topology: tpu7x:2x2x1
jax: 0.10.0
libtpu: 0.0.40
codegen_flags: <defaults>
</compile_context>

<pallas_src>
import functools

import jax
import jax.numpy as jnp
import numpy as np
from jax import lax
from jax.experimental import pallas as pl
from jax.experimental.pallas import tpu as pltpu


# ---------------------------------------------------------------------------
# pltpu.roll direction probe (cached, one tiny kernel launch).
# ---------------------------------------------------------------------------
_ROLL_SIGN = None


def _get_roll_sign():
    """Pin pltpu.roll's rotate convention against jnp.roll semantics."""
    global _ROLL_SIGN
    if _ROLL_SIGN is None:
        def probe(x_ref, o_ref):
            o_ref[...] = pltpu.roll(x_ref[...], 1, 1)

        x = jnp.tile(jnp.arange(128, dtype=jnp.float32)[None, :], (8, 1))
        y = pl.pallas_call(
            probe, out_shape=jax.ShapeDtypeStruct((8, 128), jnp.float32))(x)
        # jnp.roll convention: out[i] = in[i-1]  ->  out[0,1] == in[0,0] == 0.
        # We want shifted[p] = v[p + delta]: shift = -delta under that
        # convention, +delta under the opposite one.
        _ROLL_SIGN = -1 if float(y[0, 1]) == 0.0 else 1
    return _ROLL_SIGN


# ---------------------------------------------------------------------------
# In-kernel helpers
# ---------------------------------------------------------------------------
def _shift_lanes(v, delta, roll_sign):
    """shifted[:, p] = v[:, p + delta] for every position the caller keeps.

    Positions whose source is out of range are zeroed by the caller's border
    mask, so the circular wrap-around of the roll is harmless."""
    hw = v.shape[-1]
    if delta == 0:
        return v
    if hw % 128 == 0:
        return pltpu.roll(v, (roll_sign * delta) % hw, 1)       # XLU rotate
    # Lane-unaligned fallback: zero-filled shift via slice + concat.
    z = jnp.zeros((v.shape[0], abs(delta)), v.dtype)
    if delta > 0:
        return jnp.concatenate([v[:, delta:], z], axis=1)
    return jnp.concatenate([z, v[:, :hw + delta]], axis=1)


def _taps3x3_flat(v, H, W, cdt, roll_sign):
    """9 tap rows of a padding-1 3x3 stencil built directly on the lane-dense
    flat (C, H*W) layout (rolls + border masks; no padded scratch, no
    (C,H,W) reshapes).

    NOTE: row order of the result is (kh, kw, c) and MUST match the
    (kh, kw, ci) row order of the packed weights in the wrapper."""
    HW = H * W
    pos = lax.broadcasted_iota(jnp.int32, (1, HW), 1)            # flat position
    col = lax.broadcasted_iota(jnp.int32, (H, W), 1).reshape(1, HW)
    row_ok = {0: pos >= W, 1: None, 2: pos < (H - 1) * W}
    col_ok = {0: col >= 1, 1: None, 2: col <= W - 2}
    taps = []
    for kh in range(3):
        for kw in range(3):
            delta = (kh - 1) * W + (kw - 1)
            t = _shift_lanes(v, delta, roll_sign)
            mask = None
            for m in (row_ok[kh], col_ok[kw]):
                if m is not None:
                    mask = m if mask is None else (mask & m)
            if mask is not None:
                t = jnp.where(mask, t, 0.0)
            taps.append(t.astype(cdt))
    return jnp.concatenate(taps, axis=0)                         # (9*C, H*W)


def _taps3x3_phases(xph_ref, Cin, Ho, Wo, cdt):
    """9 tap rows for the stride-2 conv1 from the wrapper's phase-decomposed
    input: channel block p = pr*2+pc of xph holds x[2i+pr-1, 2j+pc-1], so each
    tap is a contiguous slice (no strided loads, no lane deinterleave).
    Row order (kh, kw, c) matches the packed weights."""
    def par(k):                       # tap row/col = 2*out + k - 1 -> (parity, offset)
        return (0, 0) if k == 0 else ((1, 0) if k == 1 else (0, 1))

    taps = []
    for kh in range(3):
        pr, a = par(kh)
        for kw in range(3):
            pc, b = par(kw)
            p = pr * 2 + pc
            blk = xph_ref[0, p * Cin:(p + 1) * Cin, a:a + Ho, b:b + Wo]
            taps.append(blk.reshape(Cin, Ho * Wo).astype(cdt))
    return jnp.concatenate(taps, axis=0)                         # (9*Cin, Ho*Wo)


def _basic_block_kernel(*refs, H, W, Cin, Cout, s0, has_shortcut, cdt,
                        roll_sign):
    if has_shortcut:
        (x_ref, w1_ref, b1_ref, w2_ref, b2_ref, wsc_ref, bsc_ref, o_ref) = refs
    else:
        (x_ref, w1_ref, b1_ref, w2_ref, b2_ref, o_ref) = refs

    Ho = (H - 1) // s0 + 1
    Wo = (W - 1) // s0 + 1

    # ---- conv1 (3x3, stride s0) + bias + ReLU : one packed K=9*Cin matmul --
    # (BN1 scale is folded into w1 in the wrapper; only the bias survives.)
    if s0 == 1:
        x = x_ref[0]                                    # (Cin, H*W) f32
        col1 = _taps3x3_flat(x, H, W, cdt, roll_sign)
    else:
        col1 = _taps3x3_phases(x_ref, Cin, Ho, Wo, cdt)
    h = jnp.dot(w1_ref[...], col1, preferred_element_type=jnp.float32)
    h = jnp.maximum(h + b1_ref[...], 0.0)               # (Cout, Ho*Wo) f32

    # ---- conv2 (3x3, stride 1) + bias : taps straight off the f32 h --------
    col2 = _taps3x3_flat(h, Ho, Wo, cdt, roll_sign)
    out = jnp.dot(w2_ref[...], col2, preferred_element_type=jnp.float32)
    out = out + b2_ref[...]

    # ---- shortcut (1x1 conv + folded BN, or identity) -----------------------
    if has_shortcut:
        if s0 == 1:
            xs = x.astype(cdt)                          # (Cin, H*W)
        else:
            # even/even parity plane == x[2i, 2j]: exactly the stride-2 1x1 taps
            xs = x_ref[0, 3 * Cin:4 * Cin, 0:Ho, 0:Wo]
            xs = xs.reshape(Cin, Ho * Wo).astype(cdt)
        sc = jnp.dot(wsc_ref[...], xs, preferred_element_type=jnp.float32)
        sc = sc + bsc_ref[...]
    else:
        sc = x                                          # identity (f32)

    # ---- residual add + ReLU (f32 epilogue), lane-dense store ---------------
    o_ref[0] = jnp.maximum(out + sc, 0.0).astype(o_ref.dtype)


# ---------------------------------------------------------------------------
# BN folding shared by the kernel wrapper and the reference (identical quant).
# ---------------------------------------------------------------------------
def fold_block_params(params, cdt, has_shortcut):
    folded = {
        "w1f": (params["w1"] * params["scale1"]).astype(cdt),   # (3,3,Cin,Cout)
        "w2f": (params["w2"] * params["scale2"]).astype(cdt),
        "b1": params["bias1"].astype(jnp.float32),
        "b2": params["bias2"].astype(jnp.float32),
    }
    if has_shortcut:
        folded["wscf"] = (params["w_sc"] * params["scale_sc"]).astype(cdt)
        folded["bsc"] = params["bias_sc"].astype(jnp.float32)
    return folded


# ---------------------------------------------------------------------------
# Public forward: NCHW in, NCHW out.
# ---------------------------------------------------------------------------
def basic_block_forward(x_nchw, params, stride=(1, 1),
                        compute_dtype=jnp.bfloat16):
    s0, s1 = stride
    # A standard BasicBlock never strides conv2 (the residual add would
    # shape-error otherwise).
    assert s1 == 1, "stride[1] must be 1 for the residual shapes to match"

    N, Cin, H, W = x_nchw.shape
    Cout = params["w1"].shape[-1]
    Ho = (H - 1) // s0 + 1
    Wo = (W - 1) // s0 + 1
    HWo = Ho * Wo
    has_shortcut = (s0 != 1) or (Cin != Cout)
    cdt = compute_dtype
    roll_sign = _get_roll_sign()

    f = fold_block_params(params, cdt, has_shortcut)
    # Pack weights for the im2col matmuls.  Row order of the packed K axis is
    # (kh, kw, ci) and MUST match the tap concat order in _taps3x3_* above.
    w1p = f["w1f"].reshape(9 * Cin, Cout).T            # (Cout, 9*Cin), cdt
    w2p = f["w2f"].reshape(9 * Cout, Cout).T           # (Cout, 9*Cout), cdt
    b1 = f["b1"].reshape(Cout, 1)
    b2 = f["b2"].reshape(Cout, 1)

    if s0 == 1:
        x_in = x_nchw.reshape(N, Cin, H * W)           # free reshape, lane-dense
        x_spec = pl.BlockSpec((1, Cin, H * W), lambda n: (n, 0, 0))
    else:
        # Phase-decompose x once in XLA so the kernel's stride-2 taps are
        # contiguous slices.  Channel block p = pr*2+pc of the result holds
        # x[..., 2*i + pr - 1, 2*j + pc - 1] (zero outside the image).
        Hh, Wh = Ho + 1, Wo + 1
        xpad = jnp.pad(x_nchw, ((0, 0), (0, 0),
                                (1, 2 * Hh - 1 - H), (1, 2 * Wh - 1 - W)))
        xph = xpad.reshape(N, Cin, Hh, 2, Wh, 2).transpose(0, 3, 5, 1, 2, 4)
        x_in = xph.reshape(N, 4 * Cin, Hh, Wh)
        x_spec = pl.BlockSpec((1, 4 * Cin, Hh, Wh), lambda n: (n, 0, 0, 0))

    inputs = [x_in, w1p, b1, w2p, b2]
    in_specs = [
        x_spec,
        pl.BlockSpec((Cout, 9 * Cin), lambda n: (0, 0)),    # VMEM-resident
        pl.BlockSpec((Cout, 1), lambda n: (0, 0)),
        pl.BlockSpec((Cout, 9 * Cout), lambda n: (0, 0)),
        pl.BlockSpec((Cout, 1), lambda n: (0, 0)),
    ]
    if has_shortcut:
        inputs += [f["wscf"].T, f["bsc"].reshape(Cout, 1)]  # (Cout, Cin)
        in_specs += [
            pl.BlockSpec((Cout, Cin), lambda n: (0, 0)),
            pl.BlockSpec((Cout, 1), lambda n: (0, 0)),
        ]

    kernel = functools.partial(
        _basic_block_kernel, H=H, W=W, Cin=Cin, Cout=Cout, s0=s0,
        has_shortcut=has_shortcut, cdt=cdt, roll_sign=roll_sign)

    out3 = pl.pallas_call(
        kernel,
        out_shape=jax.ShapeDtypeStruct((N, Cout, HWo), x_nchw.dtype),
        grid=(N,),
        in_specs=in_specs,
        out_specs=pl.BlockSpec((1, Cout, HWo), lambda n: (n, 0, 0)),
        compiler_params=pltpu.CompilerParams(
            dimension_semantics=("parallel",),     # batch split across TCs
            # Working set here is tiny; 32 MiB also fits v7x's 64 MiB/TC VMEM.
            vmem_limit_bytes=32 * 1024 * 1024),
    )(*inputs)

    return out3.reshape(N, Cout, Ho, Wo)               # free reshape


# ---------------------------------------------------------------------------
# Deterministic synthetic parameters (mirrors the module's shapes; BN params
# already in folded scale/bias form).
# ---------------------------------------------------------------------------
def make_params(key, in_channels, out_channels, need_shortcut):
    ks = jax.random.split(key, 16)
    eps = 1e-5

    def bn_fold(kg, kb, km, kv, c):
        gamma = 1.0 + 0.1 * jax.random.normal(kg, (c,), jnp.float32)
        beta = 0.1 * jax.random.normal(kb, (c,), jnp.float32)
        mean = 0.1 * jax.random.normal(km, (c,), jnp.float32)
        var = jax.random.uniform(kv, (c,), jnp.float32, 0.5, 1.5)
        scale = gamma / jnp.sqrt(var + eps)
        bias = beta - mean * scale
        return scale, bias

    p = {}
    p["w1"] = 0.1 * jax.random.normal(
        ks[0], (3, 3, in_channels, out_channels), jnp.float32)     # HWIO
    p["scale1"], p["bias1"] = bn_fold(ks[1], ks[2], ks[3], ks[4], out_channels)
    p["w2"] = 0.1 * jax.random.normal(
        ks[5], (3, 3, out_channels, out_channels), jnp.float32)
    p["scale2"], p["bias2"] = bn_fold(ks[6], ks[7], ks[8], ks[9], out_channels)
    if need_shortcut:
        p["w_sc"] = 0.1 * jax.random.normal(
            ks[10], (in_channels, out_channels), jnp.float32)      # (Cin, Cout)
        p["scale_sc"], p["bias_sc"] = bn_fold(ks[11], ks[12], ks[13], ks[14],
                                              out_channels)
    return p


# ---------------------------------------------------------------------------
# Pure-JAX reference (same folded weights / operand quantization as the kernel)
# ---------------------------------------------------------------------------
def reference_forward(x, params, stride=(1, 1), compute_dtype=jnp.float32):
    s0, s1 = stride
    cdt = compute_dtype
    dn = ("NCHW", "HWIO", "NCHW")
    N, Cin, H, W = x.shape
    Cout = params["w1"].shape[-1]
    has_shortcut = (s0 != 1) or (Cin != Cout)
    f = fold_block_params(params, cdt, has_shortcut)

    def conv(inp, w, strides, pad):
        return lax.conv_general_dilated(
            inp.astype(cdt), w, strides, pad,
            dimension_numbers=dn, precision=lax.Precision.HIGHEST,
            preferred_element_type=jnp.float32)

    def addb(t, b):
        return t + b.reshape(1, -1, 1, 1)

    h = jnp.maximum(addb(conv(x, f["w1f"], (s0, s0), ((1, 1), (1, 1))),
                         f["b1"]), 0.0)
    out = addb(conv(h, f["w2f"], (s1, s1), ((1, 1), (1, 1))), f["b2"])
    if has_shortcut:
        w_sc = f["wscf"].reshape(1, 1, Cin, Cout)
        sc = addb(conv(x, w_sc, (s0, s0), ((0, 0), (0, 0))), f["bsc"])
    else:
        sc = x
    return jnp.maximum(out + sc, 0.0)


# ---------------------------------------------------------------------------
if __name__ == "__main__":
    key = jax.random.PRNGKey(0)

    configs = [
        # name, N, Cin, Cout, H, W, stride, compute dtype, tolerance
        ("proj_bf16",       2, 4, 8, 16, 16, (1, 1), jnp.bfloat16, 5e-3),
        ("identity_bf16",   2, 8, 8, 16, 16, (1, 1), jnp.bfloat16, 5e-3),
        ("downsample_bf16", 2, 4, 8, 32, 32, (2, 1), jnp.bfloat16, 5e-3),
        ("proj_f32",        2, 4, 8, 16, 16, (1, 1), jnp.float32,  1e-3),
    ]

    for name, N, Cin, Cout, H, W, stride, cdt, tol in configs:
        kx, kp, key = jax.random.split(key, 3)
        x = jax.random.normal(kx, (N, Cin, H, W), jnp.float32)   # NCHW
        params = make_params(kp, Cin, Cout,
                             need_shortcut=(stride[0] != 1 or Cin != Cout))

        out = jax.block_until_ready(
            basic_block_forward(x, params, stride=stride, compute_dtype=cdt))
        ref = jax.block_until_ready(
            reference_forward(x, params, stride=stride, compute_dtype=cdt))

        Ho = (H - 1) // stride[0] + 1
        Wo = (W - 1) // stride[0] + 1
        assert out.shape == (N, Cout, Ho, Wo), (name, out.shape)
        np.testing.assert_allclose(np.asarray(out), np.asarray(ref),
                                   rtol=tol, atol=tol, err_msg=name)

    print("KERNEL_OK")
</pallas_src>

<mosaic_0001>
module attributes {stable_mosaic.version = 11 : i64} {
  func.func @probe(%arg0: memref<8x128xf32, #tpu.memory_space<vmem>>, %arg1: memref<8x128xf32, #tpu.memory_space<vmem>>) attributes {dimension_semantics = [], scalar_prefetch = 0 : i64, scratch_operands = 0 : i64, tpu.core_type = #tpu.core_type<tc>} {
    %c0 = arith.constant 0 : index
    %c0_0 = arith.constant 0 : index
    %0 = vector.load %arg0[%c0, %c0_0] : memref<8x128xf32, #tpu.memory_space<vmem>>, vector<8x128xf32>
    %c1_i32 = arith.constant 1 : i32
    %1 = tpu.dynamic_rotate %0 by %c1_i32 dim 1 : vector<8x128xf32>, i32 -> vector<8x128xf32>
    %c0_1 = arith.constant 0 : index
    %c0_2 = arith.constant 0 : index
    %2 = vector.load %arg1[%c0_1, %c0_2] : memref<8x128xf32, #tpu.memory_space<vmem>>, vector<8x128xf32>
    tpu.vector_store %arg1[%c0_1, %c0_2], %1 {strides = array<i32>} : memref<8x128xf32, #tpu.memory_space<vmem>>, vector<8x128xf32>,
    return
  }
}

</mosaic_0001>

<bundles_post_ra>
// kernel: tpu_custom_call.1
= control target key start
LH: loop header
LB: loop body
LE: loop exit
PB: predicated region body
PF: predicated region fallthrough
CT: control target
= control target key end

     0   :  { %6 = vsyncpa [#allocation3], 0  ;;  %s128_s0 = inlined_call_operand.hbm [shape: f32[8,128], index: 0, kind: input, shape index: {}]   ;;  %s129_s1 = inlined_call_operand.hbm [shape: f32[8,128], index: 1, kind: output, shape index: {}]  }
   0x1   :  { %7 = vsyncpa [#allocation4], 0  ;;  %s91_s6 = smov [#allocation2]   ;;  %s43_s10 = scalar_lea.hbm %s128_s0, 128 }
   0x2   :  { %s14_s7 = sshll.u32 %s91_s6, 4  ;;  %p44_p0 = scmp.ne.s32.totalorder %s128_s0, %s43_s10  ;;  %s15_s7 = int_to_ptr.vmem [resolvable:$true] %s14_s7 }
   0x3   :  { %p47_p1 = scmp.lt.u32.totalorder %s43_s10, %s128_s0 }
   0x5   :  { %p49_p2 = pnand %p47_p1, %p44_p0 }
   0x7   :  { %52 = shalt.err (!%p49_p2)
}
   0x8   :  { %s53_s15 = scalar_lea.vmem %s15_s7, 128  ;;  %p58_p4 = scmp.lt.s32.totalorder %s15_s7, %s15_s7 }
   0x9   :  { %p54_p3 = scmp.ne.s32.totalorder %s15_s7, %s53_s15  ;;  %p59_p5 = scmp.lt.s32.totalorder %s53_s15, %s53_s15 }
   0xb   :  { %p60_p6 = por %p59_p5, %p58_p4 }
   0xd   :  { %p61_p7 = pnand %p60_p6, %p54_p3 }
   0xf   :  { %64 = shalt.err (!%p61_p7)
}
  0x10   :  { %17 = dma.hbm_to_vmem [thread:$0]  %s128_s0, 128, %s15_s7, [#allocation3]  }
  0x11   :  { %87 = dma.done.wait [#allocation3], 128  }
  0x12   :  { %88 = vsyncadd [#allocation3], 4294967168  ;;  %v21_v0 = vld [vmem:[#allocation2] sm:$0xff]  ;;  %s92_s18 = smov 1   ;;  %s93_s19 = smov [#allocation5]  }
  0x13   :  { %22 = vrot.lane.b32.xlu0 %v21_v0, %s92_s18  ;;  %s31_s20 = sshll.u32 %s93_s19, 4  ;;  %s32_s20 = int_to_ptr.vmem [resolvable:$true] %s31_s20 }
  0x14   :  { %s65_s21 = scalar_lea.vmem %s32_s20, 128  ;;  %p70_p9 = scmp.lt.s32.totalorder %s32_s20, %s32_s20 }
  0x15   :  { %p66_p8 = scmp.ne.s32.totalorder %s32_s20, %s65_s21  ;;  %p71_p10 = scmp.lt.s32.totalorder %s65_s21, %s65_s21 }
  0x17   :  { %p72_p11 = por %p71_p10, %p70_p9 }
  0x19   :  { %p73_p12 = pnand %p72_p11, %p66_p8 }
  0x85   :  { %v23_v1 = vpop.permute.xlu0 %22 }
  0x86   :  { %24 = vst [vmem:[#allocation5] sm:$0xff] %v23_v1 }
  0x87   :  { %76 = shalt.err (!%p73_p12)
}
  0x88   :  { %s77_s0 = scalar_lea.hbm %s129_s1, 128 }
  0x89   :  { %p78_p13 = scmp.ne.s32.totalorder %s129_s1, %s77_s0  ;;  %p81_p0 = scmp.lt.u32.totalorder %s77_s0, %s129_s1 }
  0x8b   :  { %p83_p1 = pnand %p81_p0, %p78_p13 }
  0x8d   :  { %86 = shalt.err (!%p83_p1)
}
  0x8e   :  { %34 = dma.vmem_to_hbm [thread:$0]  %s32_s20, 128, %s129_s1, [#allocation4]  }
  0x8f   :  { %89 = dma.done.wait [#allocation4], 128  }
  0x90   :  { %90 = vsyncadd [#allocation4], 4294967168 }
  0x91   :  { %38 = vsyncpa [#allocation3], 1 }
  0x92   :  { %39 = vsyncpa [#allocation4], 1 }

</bundles_post_ra>
